<compile_context>
chip_gen: v7x
topology: tpu7x:2x2x1
jax: 0.10.0
libtpu: 0.0.40
codegen_flags: <defaults>
</compile_context>

<pallas_src>
import functools

import jax
import jax.numpy as jnp
from jax.experimental import pallas as pl
from jax.experimental.pallas import tpu as pltpu

FEATURE_SIZE = 2
HIDDEN_SIZE = 16
OUTPUT_SIZE = 2

LANE = 128          # TPU lane width
CHUNK_N = 512       # nodes processed per in-kernel chunk (multiple of 128)
MAX_TILE_N = 8192   # nodes per grid step (multiple of CHUNK_N)


def _round_up(a, b):
    return ((a + b - 1) // b) * b


def simple_gnn_kernel(x_ref, w1_ref, b1_ref, w2_ref, b2_ref, out_ref, *, chunk_n):
    """One N-tile of the forward pass, node axis on lanes.

    x_ref  : [F, TILE_N]   node features (nodes on lanes)
    w1_ref : [H, F]        fc1 weight (torch [out, in] layout)
    b1_ref : [H, 1]        fc1 bias
    w2_ref : [O, H]        fc2 weight (torch [out, in] layout)
    b2_ref : [O, 1]        fc2 bias
    out_ref: [O, TILE_N]   log_softmax over classes (sublane axis)
    """
    tile_n = x_ref.shape[1]
    n_chunks = tile_n // chunk_n  # static Python int

    # Hoist weight loads and bias lane-broadcasts out of the chunk loop.
    w1 = w1_ref[...]
    w2 = w2_ref[...]
    b1c = jnp.broadcast_to(b1_ref[...], (HIDDEN_SIZE, chunk_n))
    b2c = jnp.broadcast_to(b2_ref[...], (OUTPUT_SIZE, chunk_n))

    def _process(off):
        x = x_ref[:, pl.ds(off, chunk_n)]

        # fc1 + ReLU: [H, F] @ [F, chunk] -> [H, chunk], N on MXU output lanes.
        h = jnp.dot(w1, x, preferred_element_type=jnp.float32) + b1c
        h = jnp.maximum(h, 0.0)

        # F.dropout(x, training=self.training): inference semantics -> identity.
        # TODO(synk): training-mode dropout would use pltpu.prng_seed +
        # pltpu.stateful_bernoulli; not needed for the inference forward.

        # fc2: [O, H] @ [H, chunk] -> [O, chunk]
        logits = jnp.dot(w2, h, preferred_element_type=jnp.float32) + b2c

        # log_softmax over the class axis (axis 0 = sublanes). With O == 2 this
        # is pure VPU/EUP elementwise work on two sublane rows.
        if logits.shape[0] == 2:
            l0 = logits[0:1, :]
            l1 = logits[1:2, :]
            m = jnp.maximum(l0, l1)
            lse = m + jnp.log(jnp.exp(l0 - m) + jnp.exp(l1 - m))
        else:
            m = jnp.max(logits, axis=0, keepdims=True)
            lse = m + jnp.log(jnp.sum(jnp.exp(logits - m), axis=0, keepdims=True))

        out_ref[:, pl.ds(off, chunk_n)] = (logits - lse).astype(out_ref.dtype)

    if n_chunks == 1:
        _process(0)
    else:
        def body(c, carry):
            _process(pl.multiple_of(c * chunk_n, chunk_n))
            return carry
        jax.lax.fori_loop(0, n_chunks, body, 0)


def simple_gnn_forward(x, w1, b1, w2, b2):
    """x: [N, feature_size] f32.  Weights in torch layout (w1 [H,F], w2 [O,H]),
    biases as column vectors ([H,1], [O,1]).  Returns [N, output_size] log-probs."""
    n = x.shape[0]

    # Adaptive tiling along the node axis (all Python/static):
    #  - small graphs: one grid step, padded only to the 128-lane boundary;
    #  - large graphs: big grid steps (amortize per-step overhead), processed
    #    inside the kernel in CHUNK_N-lane pieces.
    if n <= CHUNK_N:
        tile_n = _round_up(max(n, 1), LANE)
        chunk = tile_n
    else:
        tile_n = min(MAX_TILE_N, _round_up(n, CHUNK_N))
        chunk = CHUNK_N
    assert tile_n % chunk == 0

    n_pad = _round_up(n, tile_n)
    grid = (n_pad // tile_n,)

    # Lane-dense layout: nodes on the last (lane) axis, zero-pad to the tile.
    xt = jnp.pad(x.T, ((0, 0), (0, n_pad - n)))  # [F, n_pad]

    flops = 2 * n_pad * (FEATURE_SIZE * HIDDEN_SIZE + HIDDEN_SIZE * OUTPUT_SIZE)
    bytes_accessed = 4 * (n_pad * (FEATURE_SIZE + OUTPUT_SIZE)
                          + HIDDEN_SIZE * FEATURE_SIZE + HIDDEN_SIZE
                          + OUTPUT_SIZE * HIDDEN_SIZE + OUTPUT_SIZE)
    transcendentals = 3 * n_pad  # 2x exp + 1x log per node (O == 2)

    out_t = pl.pallas_call(
        functools.partial(simple_gnn_kernel, chunk_n=chunk),
        out_shape=jax.ShapeDtypeStruct((OUTPUT_SIZE, n_pad), jnp.float32),
        grid=grid,
        in_specs=[
            pl.BlockSpec((FEATURE_SIZE, tile_n), lambda i: (0, i)),        # x tile
            pl.BlockSpec((HIDDEN_SIZE, FEATURE_SIZE), lambda i: (0, 0)),   # w1
            pl.BlockSpec((HIDDEN_SIZE, 1), lambda i: (0, 0)),              # b1
            pl.BlockSpec((OUTPUT_SIZE, HIDDEN_SIZE), lambda i: (0, 0)),    # w2
            pl.BlockSpec((OUTPUT_SIZE, 1), lambda i: (0, 0)),              # b2
        ],
        out_specs=pl.BlockSpec((OUTPUT_SIZE, tile_n), lambda i: (0, i)),
        compiler_params=pltpu.CompilerParams(
            dimension_semantics=("parallel",),          # shard N across TCs (v7x)
            vmem_limit_bytes=32 * 1024 * 1024,          # safe on v5e/v6e/v7x
        ),
        cost_estimate=pl.CostEstimate(
            flops=flops,
            transcendentals=transcendentals,
            bytes_accessed=bytes_accessed,
        ),
    )(xt, w1, b1, w2, b2)

    # Back to the PyTorch-facing [N, O] layout; drop padded nodes.
    return out_t[:, :n].T


def init_params(key):
    """PyTorch-Linear-style init (uniform(-1/sqrt(fan_in), +1/sqrt(fan_in))),
    weights stored in torch's [out, in] layout (what the kernel expects)."""
    k1, k2, k3, k4 = jax.random.split(key, 4)
    bound1 = 1.0 / (FEATURE_SIZE ** 0.5)
    bound2 = 1.0 / (HIDDEN_SIZE ** 0.5)
    w1 = jax.random.uniform(k1, (HIDDEN_SIZE, FEATURE_SIZE), jnp.float32,
                            -bound1, bound1)
    b1 = jax.random.uniform(k2, (HIDDEN_SIZE, 1), jnp.float32, -bound1, bound1)
    w2 = jax.random.uniform(k3, (OUTPUT_SIZE, HIDDEN_SIZE), jnp.float32,
                            -bound2, bound2)
    b2 = jax.random.uniform(k4, (OUTPUT_SIZE, 1), jnp.float32, -bound2, bound2)
    return w1, b1, w2, b2


def reference_forward(x, w1, b1, w2, b2):
    h = jnp.maximum(x @ w1.T + b1.T, 0.0)
    logits = h @ w2.T + b2.T
    return jax.nn.log_softmax(logits, axis=1)


if __name__ == "__main__":
    key = jax.random.PRNGKey(0)
    k_x, k_p, k_x2 = jax.random.split(key, 3)

    w1, b1, w2, b2 = init_params(k_p)
    fwd = jax.jit(simple_gnn_forward)

    # "data.x" for a small graph: [N, 1, feature_size] -> squeeze -> [N, F].
    n_nodes = 8
    data_x = jax.random.normal(k_x, (n_nodes, 1, FEATURE_SIZE), jnp.float32)
    x = jnp.squeeze(data_x, axis=1)  # [N, feature_size]  (glue, plain JAX)

    out = jax.block_until_ready(fwd(x, w1, b1, w2, b2))
    ref = reference_forward(x, w1, b1, w2, b2)
    assert out.shape == (n_nodes, OUTPUT_SIZE)
    assert jnp.allclose(out, ref, atol=1e-5, rtol=1e-5), "mismatch vs JAX reference (small)"

    # Larger graph: exercises the multi-chunk in-kernel loop, multi-step grid
    # and node padding (still tiny data: 9000 x 2 f32).
    n_big = 9000
    x_big = jax.random.normal(k_x2, (n_big, FEATURE_SIZE), jnp.float32)
    out_big = jax.block_until_ready(fwd(x_big, w1, b1, w2, b2))
    ref_big = reference_forward(x_big, w1, b1, w2, b2)
    assert out_big.shape == (n_big, OUTPUT_SIZE)
    assert jnp.allclose(out_big, ref_big, atol=1e-5, rtol=1e-5), "mismatch vs JAX reference (big)"

    print("KERNEL_OK")
</pallas_src>

<mosaic_0001>
module attributes {stable_mosaic.version = 11 : i64} {
  func.func @simple_gnn_kernel(%arg0: i32, %arg1: memref<2x128xf32, #tpu.memory_space<vmem>>, %arg2: memref<16x2xf32, #tpu.memory_space<vmem>>, %arg3: memref<16x1xf32, #tpu.memory_space<vmem>>, %arg4: memref<2x16xf32, #tpu.memory_space<vmem>>, %arg5: memref<2x1xf32, #tpu.memory_space<vmem>>, %arg6: memref<2x128xf32, #tpu.memory_space<vmem>>) attributes {dimension_semantics = [#tpu.dimension_semantics<parallel>], iteration_bounds = array<i64: 1>, scalar_prefetch = 0 : i64, scratch_operands = 0 : i64, tpu.core_type = #tpu.core_type<tc>, window_params = [{transform_indices = @transform_0, window_bounds = array<i64: 2, 128>}, {pipeline_mode = #tpu.pipeline_mode<synchronous>, transform_indices = @transform_1, window_bounds = array<i64: 16, 2>}, {pipeline_mode = #tpu.pipeline_mode<synchronous>, transform_indices = @transform_2, window_bounds = array<i64: 16, 1>}, {pipeline_mode = #tpu.pipeline_mode<synchronous>, transform_indices = @transform_3, window_bounds = array<i64: 2, 16>}, {pipeline_mode = #tpu.pipeline_mode<synchronous>, transform_indices = @transform_4, window_bounds = array<i64: 2, 1>}, {transform_indices = @transform_5, window_bounds = array<i64: 2, 128>}]} {
    %c0 = arith.constant 0 : index
    %c0_0 = arith.constant 0 : index
    %0 = vector.load %arg2[%c0, %c0_0] : memref<16x2xf32, #tpu.memory_space<vmem>>, vector<16x2xf32>
    %c0_1 = arith.constant 0 : index
    %c0_2 = arith.constant 0 : index
    %1 = vector.load %arg4[%c0_1, %c0_2] : memref<2x16xf32, #tpu.memory_space<vmem>>, vector<2x16xf32>
    %c0_3 = arith.constant 0 : index
    %c0_4 = arith.constant 0 : index
    %2 = vector.load %arg3[%c0_3, %c0_4] : memref<16x1xf32, #tpu.memory_space<vmem>>, vector<16x1xf32>
    %3 = vector.shape_cast %2 : vector<16x1xf32> to vector<16x1xf32>
    %4 = vector.broadcast %3 : vector<16x1xf32> to vector<16x128xf32>
    %c0_5 = arith.constant 0 : index
    %c0_6 = arith.constant 0 : index
    %5 = vector.load %arg5[%c0_5, %c0_6] : memref<2x1xf32, #tpu.memory_space<vmem>>, vector<2x1xf32>
    %6 = vector.shape_cast %5 : vector<2x1xf32> to vector<2x1xf32>
    %7 = vector.broadcast %6 : vector<2x1xf32> to vector<2x128xf32>
    %c0_7 = arith.constant 0 : index
    %c0_8 = arith.constant 0 : index
    %8 = vector.load %arg1[%c0_7, %c0_8] : memref<2x128xf32, #tpu.memory_space<vmem>>, vector<2x128xf32>
    %cst = arith.constant dense<0.000000e+00> : vector<16x128xf32>
    %9 = tpu.matmul %0, %8, %cst {dimension_numbers = #tpu.dot_dimension_numbers<[1], [0], [0], [1], [0, 0, 1, 1], [], []>} : vector<16x2xf32>, vector<2x128xf32>, vector<16x128xf32> -> vector<16x128xf32>
    %10 = arith.addf %9, %4 : vector<16x128xf32>
    %cst_9 = arith.constant 0.000000e+00 : f32
    %11 = vector.broadcast %cst_9 : f32 to vector<16x128xf32>
    %12 = arith.maximumf %10, %11 : vector<16x128xf32>
    %cst_10 = arith.constant dense<0.000000e+00> : vector<2x128xf32>
    %13 = tpu.matmul %1, %12, %cst_10 {dimension_numbers = #tpu.dot_dimension_numbers<[1], [0], [0], [1], [0, 0, 1, 1], [], []>} : vector<2x16xf32>, vector<16x128xf32>, vector<2x128xf32> -> vector<2x128xf32>
    %14 = arith.addf %13, %7 : vector<2x128xf32>
    %15 = vector.extract_strided_slice %14 {offsets = [0, 0], sizes = [1, 128], strides = [1, 1]} : vector<2x128xf32> to vector<1x128xf32>
    %16 = vector.extract_strided_slice %14 {offsets = [1, 0], sizes = [1, 128], strides = [1, 1]} : vector<2x128xf32> to vector<1x128xf32>
    %17 = arith.maximumf %15, %16 : vector<1x128xf32>
    %18 = arith.subf %15, %17 : vector<1x128xf32>
    %19 = math.exp %18 : vector<1x128xf32>
    %20 = arith.subf %16, %17 : vector<1x128xf32>
    %21 = math.exp %20 : vector<1x128xf32>
    %22 = arith.addf %19, %21 : vector<1x128xf32>
    %23 = math.log %22 : vector<1x128xf32>
    %24 = arith.addf %17, %23 : vector<1x128xf32>
    %25 = vector.broadcast %24 : vector<1x128xf32> to vector<2x128xf32>
    %26 = arith.subf %14, %25 : vector<2x128xf32>
    %c0_11 = arith.constant 0 : index
    %c0_12 = arith.constant 0 : index
    %27 = vector.load %arg6[%c0_11, %c0_12] : memref<2x128xf32, #tpu.memory_space<vmem>>, vector<2x128xf32>
    tpu.vector_store %arg6[%c0_11, %c0_12], %26 {strides = array<i32>} : memref<2x128xf32, #tpu.memory_space<vmem>>, vector<2x128xf32>,
    return
  }
  func.func @transform_0(%arg0: i32) -> (i32, i32) {
    %c0_i32 = arith.constant 0 : i32
    %c0_i32_0 = arith.constant 0 : i32
    return %c0_i32, %arg0 : i32, i32
  }
  func.func @transform_1(%arg0: i32) -> (i32, i32) {
    %c0_i32 = arith.constant 0 : i32
    %c0_i32_0 = arith.constant 0 : i32
    %c0_i32_1 = arith.constant 0 : i32
    return %c0_i32, %c0_i32_0 : i32, i32
  }
  func.func @transform_2(%arg0: i32) -> (i32, i32) {
    %c0_i32 = arith.constant 0 : i32
    %c0_i32_0 = arith.constant 0 : i32
    %c0_i32_1 = arith.constant 0 : i32
    return %c0_i32, %c0_i32_0 : i32, i32
  }
  func.func @transform_3(%arg0: i32) -> (i32, i32) {
    %c0_i32 = arith.constant 0 : i32
    %c0_i32_0 = arith.constant 0 : i32
    %c0_i32_1 = arith.constant 0 : i32
    return %c0_i32, %c0_i32_0 : i32, i32
  }
  func.func @transform_4(%arg0: i32) -> (i32, i32) {
    %c0_i32 = arith.constant 0 : i32
    %c0_i32_0 = arith.constant 0 : i32
    %c0_i32_1 = arith.constant 0 : i32
    return %c0_i32, %c0_i32_0 : i32, i32
  }
  func.func @transform_5(%arg0: i32) -> (i32, i32) {
    %c0_i32 = arith.constant 0 : i32
    %c0_i32_0 = arith.constant 0 : i32
    return %c0_i32, %arg0 : i32, i32
  }
}

</mosaic_0001>

<bundles_post_ra>
// kernel: simple_gnn_forward.1
= control target key start
LH: loop header
LB: loop body
LE: loop exit
PB: predicated region body
PF: predicated region fallthrough
CT: control target
= control target key end

     0   :  { %vm49_vm0 = vcmask 1041408   ;;  %vm42_vm1 = vcmask 15360   ;;  %v271_v3 = vmov 0   ;;  %v272_v6 = vmov 0.0|0.0   ;;  %s329_s0 = inlined_call_operand.vmem [shape: f32[2,128], index: 0, kind: input, shape index: {}]   ;;  %s330_s1 = inlined_call_operand.vmem [shape: f32[16,2], index: 1, kind: input, shape index: {}]   ;;  %s331_s2 = inlined_call_operand.vmem [shape: f32[16,1], index: 2, kind: input, shape index: {}]   ;;  %s332_s4 = inlined_call_operand.vmem [shape: f32[2,1], index: 4, kind: input, shape index: {}]   ;;  %s333_s3 = inlined_call_operand.vmem [shape: f32[2,16], index: 3, kind: input, shape index: {}]   ;;  %s334_s5 = inlined_call_operand.vmem [shape: f32[2,128], index: 5, kind: output, shape index: {}]  }
   0x1   :  { %v41_v0 = vld [vmem:[%s329_s0] sm:$0x3]  ;;  %v21_v2 = vld [vmem:[%s330_s1 + $0x8] sm:$0xff]  ;;  %263 = vset.pattern.permute.xlu0 %v271_v3  ;;  %264 = vset.pattern.permute.xlu1 %v271_v3  ;;  %vm273_vm2 = vmmov 0   ;;  %v274_v7 = vmov 0.0   ;;  %vm130_vm3 = vcmask 130048   ;;  %v224_v34 = vlaneseq }
   0x2   :  { %v20_v1 = vld [vmem:[%s330_s1] sm:$0xff]  ;;  %244 = vmatprep.subr.msk.mxu0 %vm49_vm0, %v41_v0  ;;  %v24_v5 = vld [vmem:[%s331_s2 + $0x8] sm:$0xff]  ;;  %256 = vmatprep.subr.bf16.mxu1 %v272_v6 }
   0x3   :  { %246 = vmatprep.mubr.msk.f32.mxu0 %vm42_vm1, %v20_v1  ;;  %v23_v4 = vld [vmem:[%s331_s2] sm:$0xff]  ;;  %245 = vmatpush3.msk.msra.mxu0 %vm49_vm0, %v41_v0  ;;  %v225_v35 = vshrl.u32 %v224_v34, 7 }
   0x4   :  { %27 = vperm.xlu0 %263, %v23_v4   ;;  %247 = vmatmul.mubr.msk.f32.vlgmr.msra.gmra.mrb[0].mxu0 %vm42_vm1, %v21_v2  ;;  %v35_v8 = vld [vmem:[%s332_s4] sm:$0x3] }
   0x5   :  { %253 = vmatprep.mubr.msk.f32.mxu1 %vm273_vm2, %v274_v7  ;;  %38 = vperm.xlu1 %264, %v35_v8   ;;  %v22_v18 = vld [vmem:[%s333_s3] sm:$0x3]  ;;  %v226_v38 = vsub.s32 0, %v225_v35 }
   0x8   :  { %32 = vperm.xlu0 %263, %v24_v5  }
  0x83   :  { %v28_v9 = vpop.permute.xlu0 %27 }
  0x84   :  { %v39_v19 = vpop.permute.xlu1 %38 }
  0x87   :  { %v33_v10 = vpop.permute.xlu0 %32 }
  0xd7   :  { %v248_v11 = vpop.f32.mrb[0].mxu0 }
  0xd8   :  { %v125_v12 = vadd.f32 %v248_v11, %v33_v10  ;;  %v119_v13 = vpop.f32.mrb[1].mxu0 }
  0xd9   :  { %v120_v14 = vadd.f32 %v119_v13, %v28_v9 }
  0xda   :  { %v129_v15 = vmax.f32 %v125_v12, 0.0 }
  0xdb   :  { %v128_v16 = vmax.f32 %v120_v14, 0.0 }
  0xdd   :  { %v257_v17 = vpack.c.bf16 %v129_v15, %v128_v16 }
  0xdf   :  { %258 = vmatpush3.bf16.msra.mxu1 %v257_v17 }
  0xe2   :  { %254 = vmatmul.mubr.msk.f32.vlgmr.msra.gmra.mrb[0].mxu1 %vm130_vm3, %v22_v18 }
 0x1b5   :  { %v200_v20 = vpop.f32.mrb[0].mxu1 }
 0x1b6   :  { %v201_v21 = vadd.f32 %v200_v20, %v39_v19  ;;  %v255_v22 = vpop.f32.mrb[1].mxu1 }
 0x1b8   :  { %v205_v23 = vrot.slane %v201_v21, 1 }
 0x1ba   :  { %v207_v24 = vmax.f32 %v201_v21, %v205_v23 }
 0x1bc   :  { %v208_v25 = vsub.f32 %v201_v21, %v207_v24  ;;  %v212_v26 = vrot.slane %v207_v24, 7 }
 0x1be   :  { %v214_v27 = vsub.f32 %v201_v21, %v212_v26  ;;  %v209_v28 = vmul.f32 1.442695, %v208_v25 }
 0x1c0   :  { %v215_v29 = vmul.f32 1.442695, %v214_v27 }
 0x1c2   :  { %265 = vpow2.f32 %v215_v29 }
 0x1c3   :  { %267 = vpow2.f32 %v209_v28 }
 0x1cc   :  { %v266_v30 = vpop.eup %265 }
 0x1cd   :  { %v218_v31 = vrot.slane %v266_v30, 1  ;;  %v268_v32 = vpop.eup %267 }
 0x1cf   :  { %v220_v33 = vadd.f32 %v268_v32, %v218_v31 }
 0x1d1   :  { %269 = vlog2.f32 %v220_v33 }
 0x1db   :  { %v270_v36 = vpop.eup %269 }
 0x1dc   :  { %v222_v37 = vmul.f32 0.6931472, %v270_v36 }
 0x1de   :  { %v223_v39 = vadd.f32 %v222_v37, %v207_v24 }
 0x1e0   :  { %v227_v40 = vrot.slane %v223_v39, %v226_v38 }
 0x1e2   :  { %v228_v41 = vsub.f32 %v201_v21, %v227_v40 }
 0x1e4   :  { %229 = vst [vmem:[%s334_s5] sm:$0x3] %v228_v41 }

</bundles_post_ra>
